<compile_context>
chip_gen: v7x
topology: tpu7x:2x2x1
jax: 0.10.0
libtpu: 0.0.40
codegen_flags: <defaults>
</compile_context>

<pallas_src>
import jax
import jax.numpy as jnp
from jax.experimental import pallas as pl
from jax.experimental.pallas import tpu as pltpu


def narx_kernel(x_ref, prev_ref, w1x_ref, w1p_ref, b1_ref, w2_ref, b2_ref,
                o_ref):
    """relu(x @ W1_x + prev * w1_p + b1) . w2_row + b2, fully in VMEM."""
    x = x_ref[...].astype(jnp.float32)        # (TB, F)
    prev = prev_ref[...].astype(jnp.float32)  # (TB, 1)

    # Layer 1: x-part on the MXU; the prev_output column of W1 is folded in as
    # a VPU broadcast-multiply (this replaces torch.cat).
    h = jnp.dot(x, w1x_ref[...],
                preferred_element_type=jnp.float32)            # (TB, H) MXU
    h = h + prev * w1p_ref[...] + b1_ref[...]                  # (TB, H) VPU
    h = jnp.maximum(h, 0.0)                                    # ReLU

    # Layer 2: (TB,32)@(32,1) would use <1% of MXU columns -> VPU
    # broadcast-mul + lane reduce instead, leaving the MXU free.
    y = jnp.sum(h * w2_ref[...], axis=-1, keepdims=True)       # (TB, 1)
    o_ref[...] = (y + b2_ref[0, 0]).astype(o_ref.dtype)        # scalar b2 (SMEM)


def narx_forward(x, prev_output, w1, b1, w2, b2, *, tb=None):
    """NARXModel.forward.

    x:           (B, F) float32 (bf16 also accepted on v6e/v7x)
    prev_output: (B, 1)
    w1:          (F+1, H) hidden_layer weight, stored (in_features, out_features)
    b1:          (1, H) or (H,)
    w2:          (H, 1)   output_layer weight, stored (in_features, out_features)
    b2:          (1, 1)
    Returns (B, 1) float32.
    """
    B, F = x.shape
    H = w1.shape[1]

    # Split W1 so the concat never materializes (folded into the kernel).
    w1_x = w1[:F]                                    # (F, H)
    w1_p = w1[F:].reshape(1, H)                      # (1, H)
    b1 = jnp.asarray(b1, jnp.float32).reshape(1, H)  # (1, H)
    w2_row = jnp.asarray(w2, jnp.float32).reshape(1, H)
    b2 = jnp.asarray(b2, jnp.float32).reshape(1, 1)

    # Batch tile derived from B: single grid step for small/medium batches,
    # capped at 4096 rows so the lane-padded double-buffered streams stay well
    # inside every generation's scoped VMEM.
    if tb is None:
        tb = min(B, 4096)
    tb = min(int(tb), B)
    if tb < B:
        tb = max(8, (tb // 8) * 8)   # sublane-aligned when the batch is tiled

    steps = pl.cdiv(B, tb)           # ragged last block is clipped by Pallas

    # Deepen pipelining only when the grid is long enough to benefit.
    bspec_kwargs = {}
    if steps >= 4:
        bspec_kwargs = dict(pipeline_mode=pl.Buffered(3))

    batch_idx = lambda i: (i, 0)
    const_idx = lambda i: (0, 0)

    out = pl.pallas_call(
        narx_kernel,
        out_shape=jax.ShapeDtypeStruct((B, 1), jnp.float32),
        grid=(steps,),
        in_specs=[
            pl.BlockSpec((tb, F), batch_idx, **bspec_kwargs),    # x (tiled)
            pl.BlockSpec((tb, 1), batch_idx, **bspec_kwargs),    # prev_output
            pl.BlockSpec((F, H), const_idx),                     # W1_x (resident)
            pl.BlockSpec((1, H), const_idx),                     # w1_p row
            pl.BlockSpec((1, H), const_idx),                     # b1
            pl.BlockSpec((1, H), const_idx),                     # w2 row
            pl.BlockSpec(memory_space=pltpu.MemorySpace.SMEM),   # b2 scalar
        ],
        out_specs=pl.BlockSpec((tb, 1), batch_idx, **bspec_kwargs),
        compiler_params=pltpu.CompilerParams(
            dimension_semantics=("parallel",),
            vmem_limit_bytes=32 * 1024 * 1024,
        ),
    )(x, prev_output, w1_x, w1_p, b1, w2_row, b2)

    return out


def init_params(key, input_size, hidden=32):
    """Deterministic init matching nn.Linear's uniform(-1/sqrt(in), 1/sqrt(in)).
       Weights stored transposed: (in_features, out_features)."""
    k1, k2, k3, k4 = jax.random.split(key, 4)
    fan_in1 = input_size + 1
    lim1 = 1.0 / jnp.sqrt(fan_in1)
    w1 = jax.random.uniform(k1, (fan_in1, hidden), jnp.float32, -lim1, lim1)
    b1 = jax.random.uniform(k2, (1, hidden), jnp.float32, -lim1, lim1)
    fan_in2 = hidden
    lim2 = 1.0 / jnp.sqrt(fan_in2)
    w2 = jax.random.uniform(k3, (hidden, 1), jnp.float32, -lim2, lim2)
    b2 = jax.random.uniform(k4, (1, 1), jnp.float32, -lim2, lim2)
    return w1, b1, w2, b2


if __name__ == "__main__":
    key = jax.random.PRNGKey(0)
    kx, kp, kparams = jax.random.split(key, 3)

    batch = 256
    input_size = 16

    x = jax.random.normal(kx, (batch, input_size), jnp.float32)
    prev_output = jax.random.normal(kp, (batch, 1), jnp.float32)
    w1, b1, w2, b2 = init_params(kparams, input_size)

    # Pure-JAX reference of the original (concat-based) math.
    xc = jnp.concatenate([x, prev_output], axis=1)
    ref = jnp.maximum(xc @ w1 + b1, 0.0) @ w2 + b2

    # Default tile: whole batch in a single grid step (amortizes the launch
    # and per-grid-step overhead — the dominant cost at this size).
    y = jax.block_until_ready(narx_forward(x, prev_output, w1, b1, w2, b2))
    assert y.shape == (batch, 1)
    assert jnp.allclose(y, ref, atol=1e-5, rtol=1e-5)

    # Also exercise the multi-step pipelined path with a ragged last block
    # (256 = 2*96 + 64): no jnp.pad, Pallas clips the overhanging rows.
    y2 = jax.block_until_ready(
        narx_forward(x, prev_output, w1, b1, w2, b2, tb=96))
    assert jnp.allclose(y2, ref, atol=1e-5, rtol=1e-5)

    print("KERNEL_OK")
</pallas_src>

<mosaic_0001>
module attributes {stable_mosaic.version = 11 : i64} {
  func.func @narx_kernel(%arg0: i32, %arg1: memref<256x16xf32, #tpu.memory_space<vmem>>, %arg2: memref<256x1xf32, #tpu.memory_space<vmem>>, %arg3: memref<16x32xf32, #tpu.memory_space<vmem>>, %arg4: memref<1x32xf32, #tpu.memory_space<vmem>>, %arg5: memref<1x32xf32, #tpu.memory_space<vmem>>, %arg6: memref<1x32xf32, #tpu.memory_space<vmem>>, %arg7: memref<1x1xf32, #tpu.memory_space<smem>>, %arg8: memref<256x1xf32, #tpu.memory_space<vmem>>) attributes {dimension_semantics = [#tpu.dimension_semantics<parallel>], iteration_bounds = array<i64: 1>, scalar_prefetch = 0 : i64, scratch_operands = 0 : i64, tpu.core_type = #tpu.core_type<tc>, window_params = [{transform_indices = @transform_0, window_bounds = array<i64: 256, 16>}, {transform_indices = @transform_1, window_bounds = array<i64: 256, 1>}, {pipeline_mode = #tpu.pipeline_mode<synchronous>, transform_indices = @transform_2, window_bounds = array<i64: 16, 32>}, {pipeline_mode = #tpu.pipeline_mode<synchronous>, transform_indices = @transform_3, window_bounds = array<i64: 1, 32>}, {pipeline_mode = #tpu.pipeline_mode<synchronous>, transform_indices = @transform_4, window_bounds = array<i64: 1, 32>}, {pipeline_mode = #tpu.pipeline_mode<synchronous>, transform_indices = @transform_5, window_bounds = array<i64: 1, 32>}, {transform_indices = @transform_6, window_bounds = array<i64: 1, 1>}, {transform_indices = @transform_7, window_bounds = array<i64: 256, 1>}]} {
    %c0 = arith.constant 0 : index
    %c0_0 = arith.constant 0 : index
    %0 = vector.load %arg1[%c0, %c0_0] : memref<256x16xf32, #tpu.memory_space<vmem>>, vector<256x16xf32>
    %c0_1 = arith.constant 0 : index
    %c0_2 = arith.constant 0 : index
    %1 = vector.load %arg2[%c0_1, %c0_2] : memref<256x1xf32, #tpu.memory_space<vmem>>, vector<256x1xf32>
    %c0_3 = arith.constant 0 : index
    %c0_4 = arith.constant 0 : index
    %2 = vector.load %arg3[%c0_3, %c0_4] : memref<16x32xf32, #tpu.memory_space<vmem>>, vector<16x32xf32>
    %cst = arith.constant dense<0.000000e+00> : vector<256x32xf32>
    %3 = tpu.matmul %0, %2, %cst {dimension_numbers = #tpu.dot_dimension_numbers<[1], [0], [0], [1], [0, 0, 1, 1], [], []>} : vector<256x16xf32>, vector<16x32xf32>, vector<256x32xf32> -> vector<256x32xf32>
    %c0_5 = arith.constant 0 : index
    %c0_6 = arith.constant 0 : index
    %4 = vector.load %arg4[%c0_5, %c0_6] : memref<1x32xf32, #tpu.memory_space<vmem>>, vector<1x32xf32>
    %5 = vector.broadcast %1 : vector<256x1xf32> to vector<256x32xf32>
    %6 = vector.broadcast %4 : vector<1x32xf32> to vector<256x32xf32>
    %7 = arith.mulf %5, %6 : vector<256x32xf32>
    %8 = arith.addf %3, %7 : vector<256x32xf32>
    %c0_7 = arith.constant 0 : index
    %c0_8 = arith.constant 0 : index
    %9 = vector.load %arg5[%c0_7, %c0_8] : memref<1x32xf32, #tpu.memory_space<vmem>>, vector<1x32xf32>
    %10 = vector.broadcast %9 : vector<1x32xf32> to vector<256x32xf32>
    %11 = arith.addf %8, %10 : vector<256x32xf32>
    %cst_9 = arith.constant 0.000000e+00 : f32
    %12 = vector.broadcast %cst_9 : f32 to vector<256x32xf32>
    %13 = arith.maximumf %11, %12 : vector<256x32xf32>
    %c0_10 = arith.constant 0 : index
    %c0_11 = arith.constant 0 : index
    %14 = vector.load %arg6[%c0_10, %c0_11] : memref<1x32xf32, #tpu.memory_space<vmem>>, vector<1x32xf32>
    %15 = vector.broadcast %14 : vector<1x32xf32> to vector<256x32xf32>
    %16 = arith.mulf %13, %15 : vector<256x32xf32>
    %cst_12 = arith.constant dense<0.000000e+00> : vector<256xf32>
    %17 = vector.multi_reduction <add>, %16, %cst_12 [1] : vector<256x32xf32> to vector<256xf32>
    %18 = vector.shape_cast %17 : vector<256xf32> to vector<256x1xf32>
    %c0_13 = arith.constant 0 : index
    %c0_14 = arith.constant 0 : index
    %19 = memref.load %arg7[%c0_13, %c0_14] : memref<1x1xf32, #tpu.memory_space<smem>>
    %20 = vector.broadcast %19 : f32 to vector<256x1xf32>
    %21 = arith.addf %18, %20 : vector<256x1xf32>
    %c0_15 = arith.constant 0 : index
    %c0_16 = arith.constant 0 : index
    %22 = vector.load %arg8[%c0_15, %c0_16] : memref<256x1xf32, #tpu.memory_space<vmem>>, vector<256x1xf32>
    tpu.vector_store %arg8[%c0_15, %c0_16], %21 {strides = array<i32>} : memref<256x1xf32, #tpu.memory_space<vmem>>, vector<256x1xf32>,
    return
  }
  func.func @transform_0(%arg0: i32) -> (i32, i32) {
    %c0_i32 = arith.constant 0 : i32
    %c0_i32_0 = arith.constant 0 : i32
    return %arg0, %c0_i32 : i32, i32
  }
  func.func @transform_1(%arg0: i32) -> (i32, i32) {
    %c0_i32 = arith.constant 0 : i32
    %c0_i32_0 = arith.constant 0 : i32
    return %arg0, %c0_i32 : i32, i32
  }
  func.func @transform_2(%arg0: i32) -> (i32, i32) {
    %c0_i32 = arith.constant 0 : i32
    %c0_i32_0 = arith.constant 0 : i32
    %c0_i32_1 = arith.constant 0 : i32
    return %c0_i32, %c0_i32_0 : i32, i32
  }
  func.func @transform_3(%arg0: i32) -> (i32, i32) {
    %c0_i32 = arith.constant 0 : i32
    %c0_i32_0 = arith.constant 0 : i32
    %c0_i32_1 = arith.constant 0 : i32
    return %c0_i32, %c0_i32_0 : i32, i32
  }
  func.func @transform_4(%arg0: i32) -> (i32, i32) {
    %c0_i32 = arith.constant 0 : i32
    %c0_i32_0 = arith.constant 0 : i32
    %c0_i32_1 = arith.constant 0 : i32
    return %c0_i32, %c0_i32_0 : i32, i32
  }
  func.func @transform_5(%arg0: i32) -> (i32, i32) {
    %c0_i32 = arith.constant 0 : i32
    %c0_i32_0 = arith.constant 0 : i32
    %c0_i32_1 = arith.constant 0 : i32
    return %c0_i32, %c0_i32_0 : i32, i32
  }
  func.func @transform_6(%arg0: i32) -> (i32, i32) {
    %c0_i32 = arith.constant 0 : i32
    %c0_i32_0 = arith.constant 0 : i32
    %c0_i32_1 = arith.constant 0 : i32
    return %c0_i32, %c0_i32_0 : i32, i32
  }
  func.func @transform_7(%arg0: i32) -> (i32, i32) {
    %c0_i32 = arith.constant 0 : i32
    %c0_i32_0 = arith.constant 0 : i32
    return %arg0, %c0_i32 : i32, i32
  }
}

</mosaic_0001>

<bundles_post_ra>
// kernel: tpu_custom_call.1
= control target key start
LH: loop header
LB: loop body
LE: loop exit
PB: predicated region body
PF: predicated region fallthrough
CT: control target
= control target key end

     0   :  { %vm292_vm0 = vcmask 130048   ;;  %v1022_v0 = vmov 0   ;;  %vm724_vm1 = vcmask 261120   ;;  %vm855_vm2 = vcmask 7168   ;;  %s1685_s1 = inlined_call_operand.vmem [shape: f32[256,1], index: 1, kind: input, shape index: {}]   ;;  %s1686_s2 = inlined_call_operand.vmem [shape: f32[16,32], index: 2, kind: input, shape index: {}]   ;;  %s1687_s0 = inlined_call_operand.vmem [shape: f32[256,16], index: 0, kind: input, shape index: {}]   ;;  %s1688_s3 = inlined_call_operand.vmem [shape: f32[1,32], index: 3, kind: input, shape index: {}]   ;;  %s1689_s4 = inlined_call_operand.vmem [shape: f32[1,32], index: 4, kind: input, shape index: {}]   ;;  %s1690_s5 = inlined_call_operand.vmem [shape: f32[1,32], index: 5, kind: input, shape index: {}]   ;;  %s1691_s6 = inlined_call_operand.<no memory space> [shape: f32[1,1], index: 6, kind: input, shape index: {}]   ;;  %s1692_s7 = inlined_call_operand.vmem [shape: f32[256,1], index: 7, kind: output, shape index: {}]  }
   0x1   :  { %1021 = vset.pattern.permute.xlu1 %v1022_v0  ;;  %v61_v1 = vld [vmem:[%s1685_s1 + $0x10] sm:$0xff]  ;;  %v91_v2 = vld [vmem:[%s1686_s2] sm:$0xff]  ;;  %v92_v3 = vld [vmem:[%s1686_s2 + $0x8] sm:$0xff]  ;;  %1020 = vset.pattern.permute.xlu0 %v1022_v0 }
   0x2   :  { %106 = vperm.xlu1 %1021, %v61_v1   ;;  %v1013_v4 = vpack.c.bf16 %v92_v3, %v91_v2  ;;  %v27_v5 = vld [vmem:[%s1687_s0] sm:$0xff]  ;;  %v62_v7 = vld [vmem:[%s1685_s1 + $0x18] sm:$0xff]  ;;  %v28_v9 = vld [vmem:[%s1687_s0 + $0x8] sm:$0xff] }
   0x3   :  { %v43_v6 = vld [vmem:[%s1687_s0 + $0x80] sm:$0xff]  ;;  %965 = vmatprep.mubr.msk.f32.mxu0 %vm292_vm0, %v27_v5  ;;  %v44_v10 = vld [vmem:[%s1687_s0 + $0x88] sm:$0xff]  ;;  %v29_v11 = vld [vmem:[%s1687_s0 + $0x10] sm:$0xff] }
   0x4   :  { %989 = vmatprep.mubr.msk.f32.mxu1 %vm292_vm0, %v43_v6  ;;  %1014 = vmatprep.subr.bf16.mxu0 %v1013_v4  ;;  %v59_v8 = vld [vmem:[%s1685_s1] sm:$0xff]  ;;  %v45_v12 = vld [vmem:[%s1687_s0 + $0x90] sm:$0xff]  ;;  %v64_v13 = vld [vmem:[%s1685_s1 + $0x28] sm:$0xff] }
   0x5   :  { %1017 = vmatprep.subr.bf16.mxu1 %v1013_v4  ;;  %1016 = vmatpush3.bf16.msra.mxu0 %v1013_v4  ;;  %v60_v14 = vld [vmem:[%s1685_s1 + $0x8] sm:$0xff]  ;;  %v30_v15 = vld [vmem:[%s1687_s0 + $0x18] sm:$0xff]  ;;  %v31_v17 = vld [vmem:[%s1687_s0 + $0x20] sm:$0xff] }
   0x6   :  { %1018 = vmatpush3.bf16.msra.mxu1 %v1013_v4  ;;  %111 = vperm.xlu1 %1021, %v62_v7   ;;  %v46_v16 = vld [vmem:[%s1687_s0 + $0x98] sm:$0xff]  ;;  %v47_v18 = vld [vmem:[%s1687_s0 + $0xa0] sm:$0xff]  ;;  %v32_v21 = vld [vmem:[%s1687_s0 + $0x28] sm:$0xff] }
   0x7   :  { %96 = vperm.xlu0 %1020, %v59_v8   ;;  %v66_v19 = vld [vmem:[%s1685_s1 + $0x38] sm:$0xff]  ;;  %v63_v20 = vld [vmem:[%s1685_s1 + $0x20] sm:$0xff]  ;;  %v48_v22 = vld [vmem:[%s1687_s0 + $0xa8] sm:$0xff] }
   0x8   :  { %966 = vmatmul.mubr.msk.f32.vlgmr.msra.gmra.mrb[0].mxu0 %vm292_vm0, %v28_v9  ;;  %v33_v23 = vld [vmem:[%s1687_s0 + $0x30] sm:$0xff]  ;;  %v68_v25 = vld [vmem:[%s1685_s1 + $0x48] sm:$0xff]  ;;  %v34_v27 = vld [vmem:[%s1687_s0 + $0x38] sm:$0xff] }
   0x9   :  { %990 = vmatmul.mubr.msk.f32.vlgmr.msra.gmra.mrb[0].mxu1 %vm292_vm0, %v44_v10  ;;  %968 = vmatprep.mubr.msk.f32.mxu0 %vm292_vm0, %v29_v11  ;;  %v49_v24 = vld [vmem:[%s1687_s0 + $0xb0] sm:$0xff]  ;;  %v50_v28 = vld [vmem:[%s1687_s0 + $0xb8] sm:$0xff]  ;;  %v35_v29 = vld [vmem:[%s1687_s0 + $0x40] sm:$0xff] }
   0xa   :  { %992 = vmatprep.mubr.msk.f32.mxu1 %vm292_vm0, %v45_v12  ;;  %121 = vperm.xlu1 %1021, %v64_v13   ;;  %v65_v26 = vld [vmem:[%s1685_s1 + $0x30] sm:$0xff]  ;;  %v51_v30 = vld [vmem:[%s1687_s0 + $0xc0] sm:$0xff]  ;;  %v70_v31 = vld [vmem:[%s1685_s1 + $0x58] sm:$0xff] }
   0xb   :  { %101 = vperm.xlu0 %1020, %v60_v14   ;;  %v67_v32 = vld [vmem:[%s1685_s1 + $0x40] sm:$0xff]  ;;  %v36_v33 = vld [vmem:[%s1687_s0 + $0x48] sm:$0xff]  ;;  %v37_v35 = vld [vmem:[%s1687_s0 + $0x50] sm:$0xff] }
   0xc   :  { %969 = vmatmul.mubr.msk.f32.gmra.mrb[2].mxu0 %vm292_vm0, %v30_v15  ;;  %v52_v34 = vld [vmem:[%s1687_s0 + $0xc8] sm:$0xff]  ;;  %v53_v36 = vld [vmem:[%s1687_s0 + $0xd0] sm:$0xff]  ;;  %v38_v39 = vld [vmem:[%s1687_s0 + $0x58] sm:$0xff] }
   0xd   :  { %993 = vmatmul.mubr.msk.f32.gmra.mrb[2].mxu1 %vm292_vm0, %v46_v16  ;;  %971 = vmatprep.mubr.msk.f32.mxu0 %vm292_vm0, %v31_v17  ;;  %v72_v37 = vld [vmem:[%s1685_s1 + $0x68] sm:$0xff]  ;;  %v69_v38 = vld [vmem:[%s1685_s1 + $0x50] sm:$0xff]  ;;  %v54_v40 = vld [vmem:[%s1687_s0 + $0xd8] sm:$0xff] }
   0xe   :  { %995 = vmatprep.mubr.msk.f32.mxu1 %vm292_vm0, %v47_v18  ;;  %131 = vperm.xlu1 %1021, %v66_v19   ;;  %v39_v41 = vld [vmem:[%s1687_s0 + $0x60] sm:$0xff]  ;;  %v74_v43 = vld [vmem:[%s1685_s1 + $0x78] sm:$0xff]  ;;  %v40_v45 = vld [vmem:[%s1687_s0 + $0x68] sm:$0xff] }
   0xf   :  { %116 = vperm.xlu0 %1020, %v63_v20   ;;  %v55_v42 = vld [vmem:[%s1687_s0 + $0xe0] sm:$0xff]  ;;  %v56_v46 = vld [vmem:[%s1687_s0 + $0xe8] sm:$0xff]  ;;  %v41_v47 = vld [vmem:[%s1687_s0 + $0x70] sm:$0xff] }
  0x10   :  { %972 = vmatmul.mubr.msk.f32.gmra.mrb[4].mxu0 %vm292_vm0, %v32_v21  ;;  %v71_v44 = vld [vmem:[%s1685_s1 + $0x60] sm:$0xff]  ;;  %v57_v48 = vld [vmem:[%s1687_s0 + $0xf0] sm:$0xff]  ;;  %v76_v49 = vld [vmem:[%s1685_s1 + $0x88] sm:$0xff] }
  0x11   :  { %996 = vmatmul.mubr.msk.f32.gmra.mrb[4].mxu1 %vm292_vm0, %v48_v22  ;;  %974 = vmatprep.mubr.msk.f32.mxu0 %vm292_vm0, %v33_v23  ;;  %v73_v50 = vld [vmem:[%s1685_s1 + $0x70] sm:$0xff]  ;;  %v42_v51 = vld [vmem:[%s1687_s0 + $0x78] sm:$0xff]  ;;  %v75_v54 = vld [vmem:[%s1685_s1 + $0x80] sm:$0xff] }
  0x12   :  { %998 = vmatprep.mubr.msk.f32.mxu1 %vm292_vm0, %v49_v24  ;;  %141 = vperm.xlu1 %1021, %v68_v25   ;;  %v58_v52 = vld [vmem:[%s1687_s0 + $0xf8] sm:$0xff]  ;;  %v80_v55 = vld [vmem:[%s1685_s1 + $0xa8] sm:$0xff]  ;;  %v77_v56 = vld [vmem:[%s1685_s1 + $0x90] sm:$0xff] }
  0x13   :  { %126 = vperm.xlu0 %1020, %v65_v26   ;;  %v78_v53 = vld [vmem:[%s1685_s1 + $0x98] sm:$0xff]  ;;  %v79_v58 = vld [vmem:[%s1685_s1 + $0xa0] sm:$0xff]  ;;  %v84_v59 = vld [vmem:[%s1685_s1 + $0xc8] sm:$0xff] }
  0x14   :  { %975 = vmatmul.mubr.msk.f32.gmra.mrb[6].mxu0 %vm292_vm0, %v34_v27  ;;  %v82_v57 = vld [vmem:[%s1685_s1 + $0xb8] sm:$0xff]  ;;  %v81_v60 = vld [vmem:[%s1685_s1 + $0xb0] sm:$0xff]  ;;  %v83_v62 = vld [vmem:[%s1685_s1 + $0xc0] sm:$0xff] }
  0x15   :  { %999 = vmatmul.mubr.msk.f32.gmra.mrb[6].mxu1 %vm292_vm0, %v50_v28  ;;  %977 = vmatprep.mubr.msk.f32.mxu0 %vm292_vm0, %v35_v29  ;;  %v86_v61 = vld [vmem:[%s1685_s1 + $0xd8] sm:$0xff]  ;;  %v88_v63 = vld [vmem:[%s1685_s1 + $0xe8] sm:$0xff]  ;;  %v85_v0 = vld [vmem:[%s1685_s1 + $0xd0] sm:$0xff] }
  0x16   :  { %1001 = vmatprep.mubr.msk.f32.mxu1 %vm292_vm0, %v51_v30  ;;  %151 = vperm.xlu1 %1021, %v70_v31   ;;  %v90_v1 = vld [vmem:[%s1685_s1 + $0xf8] sm:$0xff]  ;;  %v87_v2 = vld [vmem:[%s1685_s1 + $0xe0] sm:$0xff]  ;;  %v89_v3 = vld [vmem:[%s1685_s1 + $0xf0] sm:$0xff] }
  0x17   :  { %136 = vperm.xlu0 %1020, %v67_v32   ;;  %v1324_v25 = vld [vmem:[%s1688_s3] ss:$0 sm:$0xff] }
  0x18   :  { %978 = vmatmul.mubr.msk.f32.gmra.mrb[8].mxu0 %vm292_vm0, %v36_v33  ;;  %v1335_v33 = vld [vmem:[%s1689_s4] ss:$0 sm:$0xff] }
  0x19   :  { %1002 = vmatmul.mubr.msk.f32.gmra.mrb[8].mxu1 %vm292_vm0, %v52_v34  ;;  %980 = vmatprep.mubr.msk.f32.mxu0 %vm292_vm0, %v37_v35 }
  0x1a   :  { %1004 = vmatprep.mubr.msk.f32.mxu1 %vm292_vm0, %v53_v36  ;;  %161 = vperm.xlu1 %1021, %v72_v37  }
  0x1b   :  { %146 = vperm.xlu0 %1020, %v69_v38  }
  0x1c   :  { %981 = vmatmul.mubr.msk.f32.gmra.mrb[10].mxu0 %vm292_vm0, %v38_v39 }
  0x1d   :  { %1005 = vmatmul.mubr.msk.f32.gmra.mrb[10].mxu1 %vm292_vm0, %v54_v40  ;;  %983 = vmatprep.mubr.msk.f32.mxu0 %vm292_vm0, %v39_v41 }
  0x1e   :  { %1007 = vmatprep.mubr.msk.f32.mxu1 %vm292_vm0, %v55_v42  ;;  %171 = vperm.xlu1 %1021, %v74_v43  }
  0x1f   :  { %156 = vperm.xlu0 %1020, %v71_v44  }
  0x20   :  { %984 = vmatmul.mubr.msk.f32.gmra.mrb[12].mxu0 %vm292_vm0, %v40_v45 }
  0x21   :  { %1008 = vmatmul.mubr.msk.f32.gmra.mrb[12].mxu1 %vm292_vm0, %v56_v46  ;;  %986 = vmatprep.mubr.msk.f32.mxu0 %vm292_vm0, %v41_v47 }
  0x22   :  { %1010 = vmatprep.mubr.msk.f32.mxu1 %vm292_vm0, %v57_v48  ;;  %181 = vperm.xlu1 %1021, %v76_v49   ;;  %v1346_v49 = vld [vmem:[%s1690_s5] ss:$0 sm:$0xff] }
  0x23   :  { %166 = vperm.xlu0 %1020, %v73_v50  }
  0x24   :  { %987 = vmatmul.mubr.msk.f32.gmra.mrb[14].mxu0 %vm292_vm0, %v42_v51 }
  0x25   :  { %1011 = vmatmul.mubr.msk.f32.gmra.mrb[14].mxu1 %vm292_vm0, %v58_v52 }
  0x26   :  { %191 = vperm.xlu1 %1021, %v78_v53  }
  0x27   :  { %176 = vperm.xlu0 %1020, %v75_v54  }
  0x2a   :  { %201 = vperm.xlu1 %1021, %v80_v55  }
  0x2b   :  { %186 = vperm.xlu0 %1020, %v77_v56  }
  0x2e   :  { %211 = vperm.xlu1 %1021, %v82_v57  }
  0x2f   :  { %196 = vperm.xlu0 %1020, %v79_v58  }
  0x32   :  { %221 = vperm.xlu1 %1021, %v84_v59  }
  0x33   :  { %206 = vperm.xlu0 %1020, %v81_v60  }
  0x36   :  { %231 = vperm.xlu1 %1021, %v86_v61  }
  0x37   :  { %216 = vperm.xlu0 %1020, %v83_v62  }
  0x3a   :  { %241 = vperm.xlu1 %1021, %v88_v63  }
  0x3b   :  { %226 = vperm.xlu0 %1020, %v85_v0  }
  0x3e   :  { %251 = vperm.xlu1 %1021, %v90_v1  }
  0x3f   :  { %236 = vperm.xlu0 %1020, %v87_v2  }
  0x43   :  { %246 = vperm.xlu0 %1020, %v89_v3  }
  0x81   :  { %v1293_v4 = vpop.permute.xlu1 %106 }
  0x85   :  { %v112_v5 = vpop.permute.xlu1 %111 }
  0x86   :  { %v97_v7 = vpop.permute.xlu0 %96  ;;  %v263_v41 = vmul.f32 %v1324_v25, %v112_v5 }
  0x87   :  { %v260_v30 = vmul.f32 %v1324_v25, %v97_v7 }
  0x89   :  { %v1295_v6 = vpop.permute.xlu1 %121 }
  0x8a   :  { %v102_v9 = vpop.permute.xlu0 %101 }
  0x8b   :  { %v261_v26 = vmul.f32 %v1324_v25, %v102_v9  ;;  %v262_v9 = vmul.f32 %v1324_v25, %v1293_v4 }
  0x8d   :  { %v1297_v8 = vpop.permute.xlu1 %131 }
  0x8e   :  { %v117_v11 = vpop.permute.xlu0 %116 }
  0x8f   :  { %v264_v0 = vmul.f32 %v1324_v25, %v117_v11 }
  0x91   :  { %v1299_v10 = vpop.permute.xlu1 %141 }
  0x92   :  { %v1303_v13 = vpop.permute.xlu0 %126 }
  0x95   :  { %v1301_v12 = vpop.permute.xlu1 %151 }
  0x96   :  { %v1307_v15 = vpop.permute.xlu0 %136 }
  0x99   :  { %v1305_v14 = vpop.permute.xlu1 %161 }
  0x9a   :  { %v1311_v17 = vpop.permute.xlu0 %146 }
  0x9d   :  { %v1309_v16 = vpop.permute.xlu1 %171 }
  0x9e   :  { %v1313_v19 = vpop.permute.xlu0 %156 }
  0xa1   :  { %v182_v18 = vpop.permute.xlu1 %181 }
  0xa2   :  { %v1315_v21 = vpop.permute.xlu0 %166  ;;  %v277_v27 = vmul.f32 %v1324_v25, %v182_v18 }
  0xa5   :  { %v192_v20 = vpop.permute.xlu1 %191 }
  0xa6   :  { %v177_v23 = vpop.permute.xlu0 %176  ;;  %v279_v55 = vmul.f32 %v1324_v25, %v192_v20 }
  0xa7   :  { %v276_v31 = vmul.f32 %v1324_v25, %v177_v23 }
  0xa9   :  { %v1317_v22 = vpop.permute.xlu1 %201 }
  0xaa   :  { %v187_v28 = vpop.permute.xlu0 %186 }
  0xab   :  { %v278_v44 = vmul.f32 %v1324_v25, %v187_v28 }
  0xad   :  { %v1319_v24 = vpop.permute.xlu1 %211 }
  0xae   :  { %v197_v59 = vpop.permute.xlu0 %196 }
  0xaf   :  { %v280_v1 = vmul.f32 %v1324_v25, %v197_v59 }
  0xb1   :  { %v1328_v29 = vpop.permute.xlu1 %221 }
  0xb5   :  { %v1349_v60 = vpop.permute.xlu1 %231 }
  0xdb   :  { %v967_v32 = vpop.f32.mrb[0].mxu0 }
  0xdc   :  { %v991_v34 = vpop.f32.mrb[0].mxu1  ;;  %v461_v35 = vadd.f32 %v967_v32, %v261_v26  ;;  %v455_v37 = vpop.f32.mrb[1].mxu0 }
  0xdd   :  { %v541_v36 = vadd.f32 %v991_v34, %v277_v27  ;;  %v535_v38 = vpop.f32.mrb[1].mxu1  ;;  %v456_v39 = vadd.f32 %v455_v37, %v260_v30 }
  0xde   :  { %v536_v40 = vadd.f32 %v535_v38, %v276_v31  ;;  %v622_v42 = vadd.f32 %v1335_v33, %v461_v35 }
  0xdf   :  { %v638_v43 = vadd.f32 %v1335_v33, %v541_v36  ;;  %v621_v45 = vadd.f32 %v1335_v33, %v456_v39  ;;  %v970_v47 = vpop.f32.mrb[2].mxu0 }
  0xe0   :  { %v637_v46 = vadd.f32 %v1335_v33, %v536_v40  ;;  %v994_v48 = vpop.f32.mrb[2].mxu1  ;;  %v654_v50 = vmax.f32 %v622_v42, 0.0  ;;  %v471_v52 = vadd.f32 %v970_v47, %v263_v41  ;;  %v465_v53 = vpop.f32.mrb[3].mxu0  ;;  %v266_v40 = vmul.f32 %v1324_v25, %v1303_v13 }
  0xe1   :  { %v670_v51 = vmax.f32 %v638_v43, 0.0  ;;  %v545_v54 = vpop.f32.mrb[3].mxu1  ;;  %v653_v56 = vmax.f32 %v621_v45, 0.0  ;;  %v551_v2 = vadd.f32 %v994_v48, %v279_v55  ;;  %v466_v35 = vadd.f32 %v465_v53, %v262_v9  ;;  %v207_v43 = vpop.permute.xlu0 %206 }
  0xe2   :  { %v669_v57 = vmax.f32 %v637_v46, 0.0  ;;  %v546_v58 = vadd.f32 %v545_v54, %v278_v44  ;;  %v624_v61 = vadd.f32 %v1335_v33, %v471_v52  ;;  %v693_v63 = vmul.f32 %v1346_v49, %v654_v50  ;;  %v1371_v44 = vpop.permute.xlu1 %241 }
  0xe3   :  { %v709_v62 = vmul.f32 %v1346_v49, %v670_v51  ;;  %v973_v5 = vpop.f32.mrb[4].mxu0  ;;  %v692_v28 = vmul.f32 %v1346_v49, %v653_v56  ;;  %v640_v34 = vadd.f32 %v1335_v33, %v551_v2  ;;  %v265_v50 = vmul.f32 %v1324_v25, %v1295_v6 }
  0xe4   :  { %v639_v3 = vadd.f32 %v1335_v33, %v546_v58  ;;  %v997_v7 = vpop.f32.mrb[4].mxu1  ;;  %v475_v18 = vpop.f32.mrb[5].mxu0  ;;  %v708_v27 = vmul.f32 %v1346_v49, %v669_v57  ;;  %v656_v30 = vmax.f32 %v624_v61, 0.0  ;;  %v728_v32 = vsel %vm724_vm1, %v693_v63, 0.0 }
  0xe5   :  { %v555_v20 = vpop.f32.mrb[5].mxu1  ;;  %v476_v23 = vadd.f32 %v475_v18, %v264_v0  ;;  %v776_v31 = vsel %vm724_vm1, %v709_v62, 0.0  ;;  %729 = vadd.xlane.f32.xlu1 %v728_v32  ;;  %v725_v46 = vsel %vm724_vm1, %v692_v28, 0.0  ;;  %v672_v51 = vmax.f32 %v640_v34, 0.0  ;;  %v217_v28 = vpop.permute.xlu0 %216 }
  0xe6   :  { %v556_v26 = vadd.f32 %v555_v20, %v280_v1  ;;  %v671_v11 = vmax.f32 %v639_v3, 0.0  ;;  %777 = vadd.xlane.f32.xlu0 %v776_v31  ;;  %v773_v42 = vsel %vm724_vm1, %v708_v27, 0.0  ;;  %v695_v48 = vmul.f32 %v1346_v49, %v656_v30  ;;  %v252_v30 = vpop.permute.xlu1 %251 }
  0xe7   :  { %v625_v36 = vadd.f32 %v1335_v33, %v476_v23  ;;  %v976_v4 = vpop.f32.mrb[6].mxu0  ;;  %v623_v13 = vadd.f32 %v1335_v33, %v466_v35  ;;  %v281_v57 = vmul.f32 %v1324_v25, %v1317_v22  ;;  %v282_v58 = vmul.f32 %v1324_v25, %v207_v43 }
  0xe8   :  { %v1365_v37 = vpop.f32.mrb[6].mxu1  ;;  %v485_v38 = vpop.f32.mrb[7].mxu0  ;;  %v641_v41 = vadd.f32 %v1335_v33, %v556_v26  ;;  %v710_v47 = vmul.f32 %v1346_v49, %v671_v11  ;;  %v481_v59 = vadd.f32 %v973_v5, %v265_v50  ;;  %v734_v62 = vsel %vm724_vm1, %v695_v48, 0.0 }
  0xe9   :  { %v565_v39 = vpop.f32.mrb[7].mxu1  ;;  %v657_v45 = vmax.f32 %v625_v36, 0.0  ;;  %v486_v52 = vadd.f32 %v485_v38, %v266_v40  ;;  %774 = vadd.xlane.f32.xlu1 %v773_v42  ;;  %v655_v0 = vmax.f32 %v623_v13, 0.0  ;;  %v711_v22 = vmul.f32 %v1346_v49, %v672_v51 }
  0xea   :  { %726 = vadd.xlane.f32.xlu0 %v725_v46  ;;  %v673_v61 = vmax.f32 %v641_v41, 0.0  ;;  %v779_v6 = vsel %vm724_vm1, %v710_v47, 0.0  ;;  %v566_v2 = vadd.f32 %v565_v39, %v282_v58  ;;  %v268_v5 = vmul.f32 %v1324_v25, %v1307_v15 }
  0xeb   :  { %v1379_v53 = vpop.f32.mrb[8].mxu0  ;;  %v696_v63 = vmul.f32 %v1346_v49, %v657_v45  ;;  %v627_v1 = vadd.f32 %v1335_v33, %v486_v52  ;;  %v561_v18 = vadd.f32 %v997_v7, %v281_v57  ;;  %v267_v26 = vmul.f32 %v1324_v25, %v1297_v8 }
  0xec   :  { %v1381_v54 = vpop.f32.mrb[8].mxu1  ;;  %v495_v55 = vpop.f32.mrb[9].mxu0  ;;  %v626_v27 = vadd.f32 %v1335_v33, %v481_v59  ;;  %v782_v32 = vsel %vm724_vm1, %v711_v22, 0.0  ;;  %v712_v34 = vmul.f32 %v1346_v49, %v673_v61  ;;  %v284_v35 = vmul.f32 %v1324_v25, %v217_v28 }
  0xed   :  { %v575_v56 = vpop.f32.mrb[9].mxu1  ;;  %780 = vadd.xlane.f32.xlu1 %v779_v6  ;;  %v496_v11 = vadd.f32 %v495_v55, %v268_v5  ;;  %v737_v31 = vsel %vm724_vm1, %v696_v63, 0.0  ;;  %v659_v15 = vmax.f32 %v627_v1, 0.0  ;;  %v643_v7 = vadd.f32 %v1335_v33, %v566_v2 }
  0xee   :  { %735 = vadd.xlane.f32.xlu0 %v734_v62  ;;  %v694_v38 = vmul.f32 %v1346_v49, %v655_v0  ;;  %v642_v39 = vadd.f32 %v1335_v33, %v561_v18  ;;  %v491_v40 = vadd.f32 %v976_v4, %v267_v26  ;;  %v275_v43 = vmul.f32 %v1324_v25, %v1309_v16  ;;  %v227_v0 = vpop.permute.xlu0 %226 }
  0xef   :  { %v1390_v3 = vpop.f32.mrb[10].mxu0  ;;  %v283_v45 = vmul.f32 %v1324_v25, %v1319_v24  ;;  %v291_v46 = vmul.f32 %v1324_v25, %v252_v30  ;;  %v576_v47 = vadd.f32 %v575_v56, %v284_v35  ;;  %v658_v48 = vmax.f32 %v626_v27, 0.0 }
  0xf0   :  { %v1392_v9 = vpop.f32.mrb[10].mxu1  ;;  %v505_v20 = vpop.f32.mrb[11].mxu0  ;;  %v629_v50 = vadd.f32 %v1335_v33, %v496_v11  ;;  %v785_v51 = vsel %vm724_vm1, %v712_v34, 0.0  ;;  %v731_v13 = vsel %vm724_vm1, %v694_v38, 0.0  ;;  %v270_v4 = vmul.f32 %v1324_v25, %v1311_v17 }
  0xf1   :  { %v585_v23 = vpop.f32.mrb[11].mxu1  ;;  %738 = vadd.xlane.f32.xlu1 %v737_v31  ;;  %v571_v52 = vadd.f32 %v1365_v37, %v283_v45  ;;  %v675_v55 = vmax.f32 %v643_v7, 0.0  ;;  %v698_v57 = vmul.f32 %v1346_v49, %v659_v15  ;;  %v674_v56 = vmax.f32 %v642_v39, 0.0 }
  0xf2   :  { %783 = vadd.xlane.f32.xlu0 %v782_v32  ;;  %v628_v58 = vadd.f32 %v1335_v33, %v491_v40  ;;  %v269_v17 = vmul.f32 %v1324_v25, %v1299_v10  ;;  %v645_v37 = vadd.f32 %v1335_v33, %v576_v47  ;;  %v506_v63 = vadd.f32 %v505_v20, %v270_v4 }
  0xf3   :  { %v1405_v36 = vpop.f32.mrb[12].mxu0  ;;  %v661_v1 = vmax.f32 %v629_v50, 0.0  ;;  %v743_v22 = vsel %vm724_vm1, %v698_v57, 0.0  ;;  %v697_v5 = vmul.f32 %v1346_v49, %v658_v48  ;;  %v286_v18 = vmul.f32 %v1324_v25, %v227_v0 }
  0xf4   :  { %v1407_v8 = vpop.f32.mrb[12].mxu1  ;;  %v515_v41 = vpop.f32.mrb[13].mxu0  ;;  %v644_v26 = vadd.f32 %v1335_v33, %v571_v52  ;;  %v714_v27 = vmul.f32 %v1346_v49, %v675_v55  ;;  %v660_v28 = vmax.f32 %v628_v58, 0.0  ;;  %v501_v10 = vadd.f32 %v1379_v53, %v269_v17 }
  0xf5   :  { %v1411_v42 = vpop.f32.mrb[13].mxu1  ;;  %786 = vadd.xlane.f32.xlu1 %v785_v51  ;;  %v740_v20 = vsel %vm724_vm1, %v697_v5, 0.0  ;;  %v713_v30 = vmul.f32 %v1346_v49, %v674_v56  ;;  %v285_v11 = vmul.f32 %v1324_v25, %v1328_v29  ;;  %v631_v31 = vadd.f32 %v1335_v33, %v506_v63 }
  0xf6   :  { %732 = vadd.xlane.f32.xlu0 %v731_v13  ;;  %v586_v32 = vadd.f32 %v585_v23, %v286_v18  ;;  %v677_v34 = vmax.f32 %v645_v37, 0.0  ;;  %v791_v35 = vsel %vm724_vm1, %v714_v27, 0.0  ;;  %v700_v15 = vmul.f32 %v1346_v49, %v661_v1 }
  0xf7   :  { %v988_v16 = vpop.f32.mrb[14].mxu0  ;;  %v272_v7 = vmul.f32 %v1324_v25, %v1313_v19  ;;  %v581_v53 = vadd.f32 %v1381_v54, %v285_v11  ;;  %v676_v38 = vmax.f32 %v644_v26, 0.0  ;;  %v630_v39 = vadd.f32 %v1335_v33, %v501_v10 }
  0xf8   :  { %v1012_v24 = vpop.f32.mrb[14].mxu1  ;;  %v1426_v59 = vadd.f32 %v988_v16, %v275_v43  ;;  %v1428_v6 = vpop.f32.mrb[15].mxu0  ;;  %v788_v29 = vsel %vm724_vm1, %v713_v30, 0.0  ;;  %v699_v40 = vmul.f32 %v1346_v49, %v660_v28  ;;  %v271_v23 = vmul.f32 %v1324_v25, %v1301_v12 }
  0xf9   :  { %v611_v61 = vadd.f32 %v1012_v24, %v291_v46  ;;  %v1430_v62 = vpop.f32.mrb[15].mxu1  ;;  %744 = vadd.xlane.f32.xlu1 %v743_v22  ;;  %v663_v43 = vmax.f32 %v631_v31, 0.0  ;;  %v647_v45 = vadd.f32 %v1335_v33, %v586_v32  ;;  %v237_v46 = vpop.permute.xlu0 %236  ;;  %v516_v47 = vadd.f32 %v515_v41, %v272_v7 }
  0xfa   :  { %741 = vadd.xlane.f32.xlu0 %v740_v20  ;;  %v749_v54 = vsel %vm724_vm1, %v700_v15, 0.0  ;;  %v716_v48 = vmul.f32 %v1346_v49, %v677_v34  ;;  %v288_v50 = vmul.f32 %v1324_v25, %v237_v46  ;;  %v646_v51 = vadd.f32 %v1335_v33, %v581_v53 }
  0xfb   :  { %v652_v2 = vadd.f32 %v1335_v33, %v611_v61  ;;  %v662_v13 = vmax.f32 %v630_v39, 0.0  ;;  %v511_v4 = vadd.f32 %v1390_v3, %v271_v23  ;;  %v746_v12 = vsel %vm724_vm1, %v699_v40, 0.0 }
  0xfc   :  { %v715_v52 = vmul.f32 %v1346_v49, %v676_v38  ;;  %v287_v41 = vmul.f32 %v1324_v25, %v1349_v60  ;;  %v679_v55 = vmax.f32 %v647_v45, 0.0  ;;  %v596_v16 = vadd.f32 %v1411_v42, %v288_v50 }
  0xfd   :  { %792 = vadd.xlane.f32.xlu1 %v791_v35  ;;  %v684_v19 = vmax.f32 %v652_v2, 0.0  ;;  %v633_v24 = vadd.f32 %v1335_v33, %v516_v47  ;;  %v797_v57 = vsel %vm724_vm1, %v716_v48, 0.0  ;;  %v702_v56 = vmul.f32 %v1346_v49, %v663_v43  ;;  %v247_v60 = vpop.permute.xlu0 %246 }
  0xfe   :  { %789 = vadd.xlane.f32.xlu0 %v788_v29  ;;  %v274_v3 = vmul.f32 %v1324_v25, %v1315_v21  ;;  %v678_v61 = vmax.f32 %v646_v51, 0.0  ;;  %v591_v17 = vadd.f32 %v1392_v9, %v287_v41  ;;  %v632_v37 = vadd.f32 %v1335_v33, %v511_v4 }
  0xff   :  { %v723_v58 = vmul.f32 %v1346_v49, %v684_v19  ;;  %v794_v42 = vsel %vm724_vm1, %v715_v52, 0.0  ;;  %v701_v63 = vmul.f32 %v1346_v49, %v662_v13  ;;  %v273_v1 = vmul.f32 %v1324_v25, %v1305_v14 }
 0x100   :  { %v649_v2 = vadd.f32 %v1335_v33, %v596_v16  ;;  %v665_v21 = vmax.f32 %v633_v24, 0.0  ;;  %v526_v22 = vadd.f32 %v1428_v6, %v274_v3  ;;  %v755_v9 = vsel %vm724_vm1, %v702_v56, 0.0 }
 0x101   :  { %750 = vadd.xlane.f32.xlu1 %v749_v54  ;;  %v818_v0 = vsel %vm724_vm1, %v723_v58, 0.0  ;;  %v718_v5 = vmul.f32 %v1346_v49, %v679_v55  ;;  %v290_v18 = vmul.f32 %v1324_v25, %v247_v60  ;;  %v648_v26 = vadd.f32 %v1335_v33, %v591_v17 }
 0x102   :  { %747 = vadd.xlane.f32.xlu0 %v746_v12  ;;  %v664_v27 = vmax.f32 %v632_v37, 0.0  ;;  %v521_v28 = vadd.f32 %v1405_v36, %v273_v1  ;;  %v752_v14 = vsel %vm724_vm1, %v701_v63, 0.0  ;;  %v717_v10 = vmul.f32 %v1346_v49, %v678_v61 }
 0x103   :  { %v289_v20 = vmul.f32 %v1324_v25, %v1371_v44  ;;  %v681_v6 = vmax.f32 %v649_v2, 0.0  ;;  %v635_v30 = vadd.f32 %v1335_v33, %v526_v22  ;;  %v606_v11 = vadd.f32 %v1430_v62, %v290_v18 }
 0x104   :  { %v803_v31 = vsel %vm724_vm1, %v718_v5, 0.0  ;;  %v704_v32 = vmul.f32 %v1346_v49, %v665_v21  ;;  %v680_v34 = vmax.f32 %v648_v26, 0.0  ;;  %v634_v36 = vadd.f32 %v1335_v33, %v521_v28 }
 0x105   :  { %798 = vadd.xlane.f32.xlu1 %v797_v57  ;;  %v601_v35 = vadd.f32 %v1407_v8, %v289_v20  ;;  %v800_v15 = vsel %vm724_vm1, %v717_v10, 0.0  ;;  %v703_v25 = vmul.f32 %v1346_v49, %v664_v27  ;;  %v667_v44 = vmax.f32 %v635_v30, 0.0 }
 0x106   :  { %795 = vadd.xlane.f32.xlu0 %v794_v42  ;;  %v651_v7 = vadd.f32 %v1335_v33, %v606_v11  ;;  %v761_v62 = vsel %vm724_vm1, %v704_v32, 0.0  ;;  %v720_v53 = vmul.f32 %v1346_v49, %v681_v6  ;;  %v666_v38 = vmax.f32 %v634_v36, 0.0 }
 0x107   :  { %v650_v39 = vadd.f32 %v1335_v33, %v601_v35  ;;  %v758_v29 = vsel %vm724_vm1, %v703_v25, 0.0  ;;  %v719_v8 = vmul.f32 %v1346_v49, %v680_v34  ;;  %v706_v43 = vmul.f32 %v1346_v49, %v667_v44 }
 0x108   :  { %v683_v40 = vmax.f32 %v651_v7, 0.0  ;;  %v809_v23 = vsel %vm724_vm1, %v720_v53, 0.0  ;;  %v636_v46 = vadd.f32 %v1335_v33, %v1426_v59  ;;  %v705_v19 = vmul.f32 %v1346_v49, %v666_v38 }
 0x109   :  { %756 = vadd.xlane.f32.xlu1 %v755_v9  ;;  %v682_v45 = vmax.f32 %v650_v39, 0.0  ;;  %v806_v47 = vsel %vm724_vm1, %v719_v8, 0.0  ;;  %v767_v54 = vsel %vm724_vm1, %v706_v43, 0.0  ;;  %v1523_v52 = vstv %s1691_s6 }
 0x10a   :  { %753 = vadd.xlane.f32.xlu0 %v752_v14  ;;  %v722_v48 = vmul.f32 %v1346_v49, %v683_v40  ;;  %v668_v50 = vmax.f32 %v636_v46, 0.0  ;;  %v764_v51 = vsel %vm724_vm1, %v705_v19, 0.0 }
 0x10b   :  { %v721_v13 = vmul.f32 %v1346_v49, %v682_v45 }
 0x10c   :  { %v815_v4 = vsel %vm724_vm1, %v722_v48, 0.0  ;;  %v707_v59 = vmul.f32 %v1346_v49, %v668_v50 }
 0x10d   :  { %804 = vadd.xlane.f32.xlu1 %v803_v31  ;;  %v812_v33 = vsel %vm724_vm1, %v721_v13, 0.0 }
 0x10e   :  { %801 = vadd.xlane.f32.xlu0 %v800_v15  ;;  %v770_v12 = vsel %vm724_vm1, %v707_v59, 0.0 }
 0x111   :  { %762 = vadd.xlane.f32.xlu1 %v761_v62 }
 0x112   :  { %759 = vadd.xlane.f32.xlu0 %v758_v29 }
 0x115   :  { %810 = vadd.xlane.f32.xlu1 %v809_v23 }
 0x116   :  { %807 = vadd.xlane.f32.xlu0 %v806_v47 }
 0x119   :  { %768 = vadd.xlane.f32.xlu1 %v767_v54 }
 0x11a   :  { %765 = vadd.xlane.f32.xlu0 %v764_v51 }
 0x11d   :  { %816 = vadd.xlane.f32.xlu1 %v815_v4 }
 0x11e   :  { %813 = vadd.xlane.f32.xlu0 %v812_v33 }
 0x122   :  { %771 = vadd.xlane.f32.xlu0 %v770_v12 }
 0x126   :  { %819 = vadd.xlane.f32.xlu0 %v818_v0 }
 0x172   :  { %v730_v55 = vpop.xlane.xlu1 %729 }
 0x173   :  { %v778_v41 = vpop.xlane.xlu0 %777  ;;  %v824_v24 = vadd.f32 %v1523_v52, %v730_v55 }
 0x174   :  { %v840_v16 = vadd.f32 %v1523_v52, %v778_v41 }
 0x175   :  { %857 = vst.msk [vmem:[%s1692_s7 + $0x8] sm:$0xff] %vm855_vm2, %v824_v24 }
 0x176   :  { %873 = vst.msk [vmem:[%s1692_s7 + $0x88] sm:$0xff] %vm855_vm2, %v840_v16  ;;  %v775_v49 = vpop.xlane.xlu1 %774 }
 0x177   :  { %v727_v57 = vpop.xlane.xlu0 %726  ;;  %v839_v56 = vadd.f32 %v1523_v52, %v775_v49 }
 0x178   :  { %v823_v58 = vadd.f32 %v1523_v52, %v727_v57 }
 0x179   :  { %872 = vst.msk [vmem:[%s1692_s7 + $0x80] sm:$0xff] %vm855_vm2, %v839_v56 }
 0x17a   :  { %856 = vst.msk [vmem:[%s1692_s7] sm:$0xff] %vm855_vm2, %v823_v58  ;;  %v781_v3 = vpop.xlane.xlu1 %780 }
 0x17b   :  { %v736_v61 = vpop.xlane.xlu0 %735  ;;  %v841_v17 = vadd.f32 %v1523_v52, %v781_v3 }
 0x17c   :  { %v826_v60 = vadd.f32 %v1523_v52, %v736_v61 }
 0x17d   :  { %874 = vst.msk [vmem:[%s1692_s7 + $0x90] sm:$0xff] %vm855_vm2, %v841_v17 }
 0x17e   :  { %859 = vst.msk [vmem:[%s1692_s7 + $0x18] sm:$0xff] %vm855_vm2, %v826_v60  ;;  %v739_v37 = vpop.xlane.xlu1 %738 }
 0x17f   :  { %v784_v42 = vpop.xlane.xlu0 %783  ;;  %v827_v63 = vadd.f32 %v1523_v52, %v739_v37 }
 0x180   :  { %v842_v0 = vadd.f32 %v1523_v52, %v784_v42 }
 0x181   :  { %860 = vst.msk [vmem:[%s1692_s7 + $0x20] sm:$0xff] %vm855_vm2, %v827_v63 }
 0x182   :  { %875 = vst.msk [vmem:[%s1692_s7 + $0x98] sm:$0xff] %vm855_vm2, %v842_v0  ;;  %v787_v1 = vpop.xlane.xlu1 %786 }
 0x183   :  { %v733_v2 = vpop.xlane.xlu0 %732  ;;  %v843_v21 = vadd.f32 %v1523_v52, %v787_v1 }
 0x184   :  { %v825_v22 = vadd.f32 %v1523_v52, %v733_v2 }
 0x185   :  { %876 = vst.msk [vmem:[%s1692_s7 + $0xa0] sm:$0xff] %vm855_vm2, %v843_v21 }
 0x186   :  { %858 = vst.msk [vmem:[%s1692_s7 + $0x10] sm:$0xff] %vm855_vm2, %v825_v22  ;;  %v745_v9 = vpop.xlane.xlu1 %744 }
 0x187   :  { %v829_v5 = vadd.f32 %v1523_v52, %v745_v9  ;;  %v742_v18 = vpop.xlane.xlu0 %741 }
 0x188   :  { %v828_v26 = vadd.f32 %v1523_v52, %v742_v18 }
 0x189   :  { %862 = vst.msk [vmem:[%s1692_s7 + $0x30] sm:$0xff] %vm855_vm2, %v829_v5 }
 0x18a   :  { %v793_v27 = vpop.xlane.xlu1 %792  ;;  %861 = vst.msk [vmem:[%s1692_s7 + $0x28] sm:$0xff] %vm855_vm2, %v828_v26 }
 0x18b   :  { %v845_v28 = vadd.f32 %v1523_v52, %v793_v27  ;;  %v790_v14 = vpop.xlane.xlu0 %789 }
 0x18c   :  { %v844_v10 = vadd.f32 %v1523_v52, %v790_v14 }
 0x18d   :  { %878 = vst.msk [vmem:[%s1692_s7 + $0xb0] sm:$0xff] %vm855_vm2, %v845_v28 }
 0x18e   :  { %v751_v20 = vpop.xlane.xlu1 %750  ;;  %877 = vst.msk [vmem:[%s1692_s7 + $0xa8] sm:$0xff] %vm855_vm2, %v844_v10 }
 0x18f   :  { %v831_v6 = vadd.f32 %v1523_v52, %v751_v20  ;;  %v748_v30 = vpop.xlane.xlu0 %747 }
 0x190   :  { %v830_v11 = vadd.f32 %v1523_v52, %v748_v30 }
 0x191   :  { %864 = vst.msk [vmem:[%s1692_s7 + $0x40] sm:$0xff] %vm855_vm2, %v831_v6 }
 0x192   :  { %v799_v31 = vpop.xlane.xlu1 %798  ;;  %863 = vst.msk [vmem:[%s1692_s7 + $0x38] sm:$0xff] %vm855_vm2, %v830_v11 }
 0x193   :  { %v847_v32 = vadd.f32 %v1523_v52, %v799_v31  ;;  %v796_v34 = vpop.xlane.xlu0 %795 }
 0x194   :  { %v846_v36 = vadd.f32 %v1523_v52, %v796_v34 }
 0x195   :  { %880 = vst.msk [vmem:[%s1692_s7 + $0xc0] sm:$0xff] %vm855_vm2, %v847_v32 }
 0x196   :  { %v757_v35 = vpop.xlane.xlu1 %756  ;;  %879 = vst.msk [vmem:[%s1692_s7 + $0xb8] sm:$0xff] %vm855_vm2, %v846_v36 }
 0x197   :  { %v833_v15 = vadd.f32 %v1523_v52, %v757_v35  ;;  %v754_v25 = vpop.xlane.xlu0 %753 }
 0x198   :  { %v832_v44 = vadd.f32 %v1523_v52, %v754_v25 }
 0x199   :  { %866 = vst.msk [vmem:[%s1692_s7 + $0x50] sm:$0xff] %vm855_vm2, %v833_v15 }
 0x19a   :  { %v805_v7 = vpop.xlane.xlu1 %804  ;;  %865 = vst.msk [vmem:[%s1692_s7 + $0x48] sm:$0xff] %vm855_vm2, %v832_v44 }
 0x19b   :  { %v849_v62 = vadd.f32 %v1523_v52, %v805_v7  ;;  %v802_v53 = vpop.xlane.xlu0 %801 }
 0x19c   :  { %v848_v38 = vadd.f32 %v1523_v52, %v802_v53 }
 0x19d   :  { %882 = vst.msk [vmem:[%s1692_s7 + $0xd0] sm:$0xff] %vm855_vm2, %v849_v62 }
 0x19e   :  { %v763_v39 = vpop.xlane.xlu1 %762  ;;  %881 = vst.msk [vmem:[%s1692_s7 + $0xc8] sm:$0xff] %vm855_vm2, %v848_v38 }
 0x19f   :  { %v835_v29 = vadd.f32 %v1523_v52, %v763_v39  ;;  %v760_v8 = vpop.xlane.xlu0 %759 }
 0x1a0   :  { %v834_v40 = vadd.f32 %v1523_v52, %v760_v8 }
 0x1a1   :  { %868 = vst.msk [vmem:[%s1692_s7 + $0x60] sm:$0xff] %vm855_vm2, %v835_v29 }
 0x1a2   :  { %v811_v23 = vpop.xlane.xlu1 %810  ;;  %867 = vst.msk [vmem:[%s1692_s7 + $0x58] sm:$0xff] %vm855_vm2, %v834_v40 }
 0x1a3   :  { %v851_v43 = vadd.f32 %v1523_v52, %v811_v23  ;;  %v808_v45 = vpop.xlane.xlu0 %807 }
 0x1a4   :  { %v850_v46 = vadd.f32 %v1523_v52, %v808_v45 }
 0x1a5   :  { %884 = vst.msk [vmem:[%s1692_s7 + $0xe0] sm:$0xff] %vm855_vm2, %v851_v43 }
 0x1a6   :  { %v769_v47 = vpop.xlane.xlu1 %768  ;;  %883 = vst.msk [vmem:[%s1692_s7 + $0xd8] sm:$0xff] %vm855_vm2, %v850_v46 }
 0x1a7   :  { %v837_v19 = vadd.f32 %v1523_v52, %v769_v47  ;;  %v766_v54 = vpop.xlane.xlu0 %765 }
 0x1a8   :  { %v836_v48 = vadd.f32 %v1523_v52, %v766_v54 }
 0x1a9   :  { %870 = vst.msk [vmem:[%s1692_s7 + $0x70] sm:$0xff] %vm855_vm2, %v837_v19 }
 0x1aa   :  { %v817_v50 = vpop.xlane.xlu1 %816  ;;  %869 = vst.msk [vmem:[%s1692_s7 + $0x68] sm:$0xff] %vm855_vm2, %v836_v48 }
 0x1ab   :  { %v853_v51 = vadd.f32 %v1523_v52, %v817_v50  ;;  %v814_v13 = vpop.xlane.xlu0 %813 }
 0x1ac   :  { %v852_v4 = vadd.f32 %v1523_v52, %v814_v13 }
 0x1ad   :  { %886 = vst.msk [vmem:[%s1692_s7 + $0xf0] sm:$0xff] %vm855_vm2, %v853_v51 }
 0x1ae   :  { %885 = vst.msk [vmem:[%s1692_s7 + $0xe8] sm:$0xff] %vm855_vm2, %v852_v4 }
 0x1af   :  { %v772_v33 = vpop.xlane.xlu0 %771 }
 0x1b0   :  { %v838_v59 = vadd.f32 %v1523_v52, %v772_v33 }
 0x1b2   :  { %871 = vst.msk [vmem:[%s1692_s7 + $0x78] sm:$0xff] %vm855_vm2, %v838_v59 }
 0x1b3   :  { %v820_v12 = vpop.xlane.xlu0 %819 }
 0x1b4   :  { %v854_v41 = vadd.f32 %v1523_v52, %v820_v12 }
 0x1b6   :  { %887 = vst.msk [vmem:[%s1692_s7 + $0xf8] sm:$0xff] %vm855_vm2, %v854_v41 }

</bundles_post_ra>
